<compile_context>
chip_gen: v5e
topology: v5e:2x2
jax: 0.10.0
libtpu: 0.0.40
codegen_flags: <defaults>
</compile_context>

<pallas_src>
import functools
import math

import jax
import jax.numpy as jnp
from jax.experimental import pallas as pl
from jax.experimental.pallas import tpu as pltpu


def _round_up(x, mult):
    return (x + mult - 1) // mult * mult


def _vmem_capacity_bytes():
    """Best-effort physical VMEM per TensorCore; conservative fallback (safe on v7x)."""
    try:
        info = pltpu.get_tpu_info()
        for attr in ("vmem_capacity_bytes", "vmem_bytes", "vmem_size_bytes"):
            v = getattr(info, attr, None)
            if v:
                return int(v)
    except Exception:
        pass
    return 64 << 20  # conservative: correct-by-construction even on v7x


def _choose_block_n(c, k, logit_isize, code_isize, *, quan_enabled, use_mxu,
                    budget_bytes, sublane, cap_rows=4096):
    """Largest batch tile whose double-buffered inputs + live f32 temps fit the budget."""
    c_pad = _round_up(c, 128)                        # lane padding inside VMEM vregs
    k_pad = _round_up(k, 128)
    per_row = 2 * c_pad * logit_isize                # double-buffered logits tile
    per_row += 2 * 128 * 4                           # (tn,1) int32 labels lane-pad to 128, x2 bufs
    per_row += 4 * c_pad * 4                         # live f32 temps on class dim (z, exp, iota, where)
    if quan_enabled:
        per_row += 2 * k_pad * code_isize            # double-buffered code tile
        per_row += 3 * k_pad * 4                     # |code|, code^2, nonzero temps
    if use_mxu:
        per_row += (2 + (3 if quan_enabled else 0)) * 128 * 4   # (tn,128) dot results
    tn = budget_bytes // per_row
    tn = min(int(tn), cap_rows)
    tn = max(sublane, (tn // sublane) * sublane)
    return int(tn)


def _orthohash_kernel(*refs, s, sm, corr, n_valid, quan_enabled, use_mxu):
    """Per-tile partial sums: lane 0 = CE rows (cos margin), lane 1 = quantization rows."""
    if quan_enabled:
        logits_ref, labels_ref, code_ref, out_ref = refs
    else:
        logits_ref, labels_ref, out_ref = refs
        code_ref = None

    z = logits_ref[...].astype(jnp.float32) * s              # (TN, C)  s * logits
    labels = labels_ref[...]                                  # (TN, 1)  int32
    tn, c = z.shape

    # Row validity for the ragged last batch tile: garbage rows are selected away
    # (NOT multiplicatively masked) so inf/NaN in out-of-bounds rows cannot leak.
    row_ids = pl.program_id(0) * tn + jax.lax.broadcasted_iota(jnp.int32, (tn, 1), 0)
    valid = row_ids < n_valid

    def rowsum(x, ones):
        if use_mxu:
            # Offload the lane-axis reduction to the otherwise-idle MXU (x @ ones).
            r = jnp.dot(x, ones, preferred_element_type=jnp.float32)
            return r[:, :1]
        return jnp.sum(x, axis=1, keepdims=True)

    ones_c = jnp.ones((c, 128), jnp.float32) if use_mxu else None

    # ---- cross entropy with 'cos' margin, no one-hot / margin materialization ----
    # lse(margin) = log( sum_j exp(s*z_j - mx) + e_label * (exp(-s*m) - 1) ) + mx
    col_ids = jax.lax.broadcasted_iota(jnp.int32, (tn, c), 1)
    is_label = col_ids == labels                               # (TN, C) bool
    row_max = jnp.max(z, axis=1, keepdims=True)                # (TN, 1)  (XLU)
    e = jnp.exp(z - row_max)                                   # (TN, C)  (EUP)
    sum_all = rowsum(e, ones_c)                                # (TN, 1)
    picked_z = rowsum(jnp.where(is_label, z, 0.0), ones_c)     # (TN, 1)
    picked_e = jnp.exp(picked_z - row_max)
    lse = jnp.log(sum_all + picked_e * corr) + row_max
    ce_rows = lse - (picked_z - sm)                            # (TN, 1)
    ce_part = jnp.sum(jnp.where(valid, ce_rows, 0.0))

    quan_part = jnp.float32(0.0)
    if quan_enabled:
        # ---- quantization ('cs'): code.sign(code) = sum|code|, ||sign||^2 = nnz ----
        code = code_ref[...].astype(jnp.float32)               # (TN, K)
        kk = code.shape[1]
        ones_k = jnp.ones((kk, 128), jnp.float32) if use_mxu else None
        abs_sum = rowsum(jnp.abs(code), ones_k)
        sq_sum = rowsum(code * code, ones_k)
        nnz = rowsum((code != 0.0).astype(jnp.float32), ones_k)
        # Per-norm eps clamp like F.cosine_similarity: max(||x||,eps) = sqrt(max(x2,eps^2)).
        cos = (abs_sum
               * jax.lax.rsqrt(jnp.maximum(sq_sum, 1e-16))
               * jax.lax.rsqrt(jnp.maximum(nnz, 1e-16)))
        quan_part = jnp.sum(jnp.where(valid, 1.0 - cos, 0.0))

    # Single lane-dense (1, 8, 128) partial-sum block: lane 0 = CE, lane 1 = quantization.
    lane = jax.lax.broadcasted_iota(jnp.int32, out_ref.shape, len(out_ref.shape) - 1)
    out_ref[...] = jnp.where(lane == 0, ce_part,
                             jnp.where(lane == 1, quan_part, 0.0)).astype(jnp.float32)


def orthohash_loss(logits, code_logits, labels, *, ce=1.0, s=8.0, m=0.2, quan=0.0,
                   block_n=None, use_mxu_reductions=True):
    """JAX wrapper reproducing OrthoHashLoss.forward (multiclass=False, m_type='cos',
    quan_type='cs', onehot=False => labels are integer class indices)."""
    n, c = logits.shape
    k = code_logits.shape[-1]
    quan_enabled = float(quan) != 0.0          # compile-time specialization

    labels2d = labels.astype(jnp.int32).reshape(n, 1)

    logit_isz = jnp.dtype(logits.dtype).itemsize
    code_isz = jnp.dtype(code_logits.dtype).itemsize if quan_enabled else 4
    isz_list = [logit_isz] + ([code_isz] if quan_enabled else [])
    sublane = max(8, 32 // min(isz_list))      # 8 for f32, 16 for bf16, 32 for int8/fp8

    # Generation-aware VMEM sizing: ~3/8 of physical for live tiles, ~3/4 as the limit.
    cap = _vmem_capacity_bytes()
    budget_bytes = min(48 << 20, (cap * 3) // 8)     # 48 MiB on v5e/v6e, ~24 MiB on v7x
    vmem_limit = min(96 << 20, (cap * 3) // 4)       # 96 MiB on v5e/v6e, ~48 MiB on v7x

    if block_n is not None:
        tn = int(block_n)
    else:
        tn = _choose_block_n(c, k, logit_isz, code_isz, quan_enabled=quan_enabled,
                             use_mxu=use_mxu_reductions, budget_bytes=budget_bytes,
                             sublane=sublane)
    if tn >= n:
        tn = n                                  # one full-array tile (block == array dims)
    else:
        tn = max(sublane, (tn // sublane) * sublane)
        tn = min(tn, n)
    num_tiles = pl.cdiv(n, tn)

    kernel = functools.partial(
        _orthohash_kernel,
        s=float(s),
        sm=float(s) * float(m),
        corr=math.exp(-float(s) * float(m)) - 1.0,
        n_valid=n,
        quan_enabled=quan_enabled,
        use_mxu=use_mxu_reductions,
    )

    in_specs = [
        pl.BlockSpec((tn, c), lambda i: (i, 0)),        # logits tile (full class dim)
        pl.BlockSpec((tn, 1), lambda i: (i, 0)),        # labels tile
    ]
    args = [logits, labels2d]
    if quan_enabled:
        in_specs.append(pl.BlockSpec((tn, k), lambda i: (i, 0)))   # code tile (full K)
        args.append(code_logits)

    bytes_accessed = (logits.size * logit_isz + labels2d.size * 4
                      + (code_logits.size * code_isz if quan_enabled else 0)
                      + num_tiles * 8 * 128 * 4)
    cost = pl.CostEstimate(
        flops=int(n * (6 * c + (8 * k if quan_enabled else 0))),
        transcendentals=int(n * (c + 4)),
        bytes_accessed=int(bytes_accessed),
    )

    parts = pl.pallas_call(
        kernel,
        grid=(num_tiles,),
        in_specs=in_specs,
        out_specs=pl.BlockSpec((1, 8, 128), lambda i: (i, 0, 0)),
        out_shape=jax.ShapeDtypeStruct((num_tiles, 8, 128), jnp.float32),
        compiler_params=pltpu.CompilerParams(
            dimension_semantics=("parallel",),          # v7x: shard tiles across both TCs
            vmem_limit_bytes=int(vmem_limit),
        ),
        cost_estimate=cost,
    )(*args)

    inv_n = 1.0 / float(n)
    loss_ce = jnp.sum(parts[:, 0, 0]) * inv_n
    if quan_enabled:
        quantization = jnp.sum(parts[:, 0, 1]) * inv_n
    else:
        quantization = jnp.float32(0.0)                 # matches the torch.tensor(0.0) branch
    loss = ce * loss_ce + quan * quantization
    return loss, loss_ce, quantization


def _reference(logits, code_logits, labels, *, ce=1.0, s=8.0, m=0.2, quan=0.0):
    """Pure-JAX reference mirroring the PyTorch forward (for the sanity check)."""
    n, c = logits.shape
    onehot = jax.nn.one_hot(labels, c, dtype=jnp.float32)
    margin = s * (logits.astype(jnp.float32) - m * onehot)
    logp = jax.nn.log_softmax(margin, axis=1)
    loss_ce = -jnp.mean(jnp.sum(logp * onehot, axis=1))
    if quan != 0:
        codef = code_logits.astype(jnp.float32)
        sgn = jnp.sign(codef)
        dot = jnp.sum(codef * sgn, axis=1)
        denom = (jnp.maximum(jnp.linalg.norm(codef, axis=1), 1e-8)
                 * jnp.maximum(jnp.linalg.norm(sgn, axis=1), 1e-8))
        quantization = jnp.mean(1.0 - dot / denom)
    else:
        quantization = jnp.float32(0.0)
    return ce * loss_ce + quan * quantization


if __name__ == "__main__":
    key = jax.random.PRNGKey(0)
    k1, k2, k3, k4, k5, k6, k7, k8 = jax.random.split(key, 8)

    cfg = dict(ce=1.0, s=8.0, m=0.2, quan=0.5)

    # Case 1: single-tile path, f32, quantization enabled (N=8, C=32, K=32).
    N, C, K = 8, 32, 32
    logits = jnp.tanh(jax.random.normal(k1, (N, C), dtype=jnp.float32))
    code = jax.random.normal(k2, (N, K), dtype=jnp.float32)
    labels = jax.random.randint(k3, (N,), 0, C, dtype=jnp.int32)
    loss, _, _ = orthohash_loss(logits, code, labels, **cfg)
    jax.block_until_ready(loss)
    ref = _reference(logits, code, labels, **cfg)
    assert jnp.allclose(loss, ref, atol=1e-4, rtol=1e-4), (loss, ref)

    # Case 2: multi-tile grid with a ragged last batch tile (N=20, block_n=8 -> 3 tiles).
    N2, C2, K2 = 20, 48, 16
    logits2 = jnp.tanh(jax.random.normal(k4, (N2, C2), dtype=jnp.float32))
    code2 = jax.random.normal(k5, (N2, K2), dtype=jnp.float32)
    labels2 = jax.random.randint(k6, (N2,), 0, C2, dtype=jnp.int32)
    loss2, _, _ = orthohash_loss(logits2, code2, labels2, block_n=8, **cfg)
    jax.block_until_ready(loss2)
    ref2 = _reference(logits2, code2, labels2, **cfg)
    assert jnp.allclose(loss2, ref2, atol=1e-4, rtol=1e-4), (loss2, ref2)

    # Case 3: quan == 0 specialization (code tensor never read) with bf16 logits.
    cfg0 = dict(ce=1.0, s=8.0, m=0.2, quan=0.0)
    N3, C3, K3 = 16, 32, 32
    logits3 = jnp.tanh(jax.random.normal(k7, (N3, C3), dtype=jnp.float32)).astype(jnp.bfloat16)
    code3 = jax.random.normal(k8, (N3, K3), dtype=jnp.float32)
    labels3 = jax.random.randint(k1, (N3,), 0, C3, dtype=jnp.int32)
    loss3, _, _ = orthohash_loss(logits3, code3, labels3, **cfg0)
    jax.block_until_ready(loss3)
    ref3 = _reference(logits3, code3, labels3, **cfg0)
    assert jnp.allclose(loss3, ref3, atol=2e-4, rtol=2e-4), (loss3, ref3)

    print("KERNEL_OK")
</pallas_src>

<mosaic_0001>
module attributes {stable_mosaic.version = 11 : i64} {
  func.func @_orthohash_kernel(%arg0: i32, %arg1: memref<8x32xf32, #tpu.memory_space<vmem>>, %arg2: memref<8x1xi32, #tpu.memory_space<vmem>>, %arg3: memref<8x32xf32, #tpu.memory_space<vmem>>, %arg4: memref<1x8x128xf32, #tpu.memory_space<vmem>>) attributes {dimension_semantics = [#tpu.dimension_semantics<parallel>], iteration_bounds = array<i64: 1>, scalar_prefetch = 0 : i64, scratch_operands = 0 : i64, tpu.core_type = #tpu.core_type<tc>, window_params = [{transform_indices = @transform_0, window_bounds = array<i64: 8, 32>}, {transform_indices = @transform_1, window_bounds = array<i64: 8, 1>}, {transform_indices = @transform_2, window_bounds = array<i64: 8, 32>}, {transform_indices = @transform_3, window_bounds = array<i64: 1, 8, 128>}]} {
    %c0 = arith.constant 0 : index
    %c0_0 = arith.constant 0 : index
    %0 = vector.load %arg1[%c0, %c0_0] : memref<8x32xf32, #tpu.memory_space<vmem>>, vector<8x32xf32>
    %cst = arith.constant 8.000000e+00 : f32
    %1 = vector.broadcast %cst : f32 to vector<8x32xf32>
    %2 = arith.mulf %0, %1 : vector<8x32xf32>
    %c0_1 = arith.constant 0 : index
    %c0_2 = arith.constant 0 : index
    %3 = vector.load %arg2[%c0_1, %c0_2] : memref<8x1xi32, #tpu.memory_space<vmem>>, vector<8x1xi32>
    %c8_i32 = arith.constant 8 : i32
    %4 = arith.muli %arg0, %c8_i32 : i32
    %5 = tpu.iota {dimensions = array<i32: 0>} : vector<8x1xi32>
    %6 = vector.broadcast %4 : i32 to vector<8x1xi32>
    %7 = arith.addi %6, %5 : vector<8x1xi32>
    %c8_i32_3 = arith.constant 8 : i32
    %8 = vector.broadcast %c8_i32_3 : i32 to vector<8x1xi32>
    %9 = arith.cmpi slt, %7, %8 : vector<8x1xi32>
    %cst_4 = arith.constant 1.000000e+00 : f32
    %10 = vector.broadcast %cst_4 : f32 to vector<32x128xf32>
    %11 = tpu.iota {dimensions = array<i32: 1>} : vector<8x32xi32>
    %12 = vector.broadcast %3 : vector<8x1xi32> to vector<8x32xi32>
    %13 = arith.cmpi eq, %11, %12 : vector<8x32xi32>
    %cst_5 = arith.constant dense<0xFF800000> : vector<8xf32>
    %14 = vector.multi_reduction <maximumf>, %2, %cst_5 [1] : vector<8x32xf32> to vector<8xf32>
    %15 = vector.shape_cast %14 : vector<8xf32> to vector<8x1xf32>
    %16 = vector.broadcast %15 : vector<8x1xf32> to vector<8x32xf32>
    %17 = arith.subf %2, %16 : vector<8x32xf32>
    %18 = math.exp %17 : vector<8x32xf32>
    %cst_6 = arith.constant dense<0.000000e+00> : vector<8x128xf32>
    %19 = tpu.matmul %18, %10, %cst_6 {dimension_numbers = #tpu.dot_dimension_numbers<[1], [0], [0], [1], [0, 0, 1, 1], [], []>} : vector<8x32xf32>, vector<32x128xf32>, vector<8x128xf32> -> vector<8x128xf32>
    %20 = vector.extract_strided_slice %19 {offsets = [0, 0], sizes = [8, 1], strides = [1, 1]} : vector<8x128xf32> to vector<8x1xf32>
    %cst_7 = arith.constant 0.000000e+00 : f32
    %21 = vector.broadcast %cst_7 : f32 to vector<8x32xf32>
    %22 = arith.select %13, %2, %21 : vector<8x32xi1>, vector<8x32xf32>
    %cst_8 = arith.constant dense<0.000000e+00> : vector<8x128xf32>
    %23 = tpu.matmul %22, %10, %cst_8 {dimension_numbers = #tpu.dot_dimension_numbers<[1], [0], [0], [1], [0, 0, 1, 1], [], []>} : vector<8x32xf32>, vector<32x128xf32>, vector<8x128xf32> -> vector<8x128xf32>
    %24 = vector.extract_strided_slice %23 {offsets = [0, 0], sizes = [8, 1], strides = [1, 1]} : vector<8x128xf32> to vector<8x1xf32>
    %25 = arith.subf %24, %15 : vector<8x1xf32>
    %26 = math.exp %25 : vector<8x1xf32>
    %cst_9 = arith.constant -0.798103511 : f32
    %27 = vector.broadcast %cst_9 : f32 to vector<8x1xf32>
    %28 = arith.mulf %26, %27 : vector<8x1xf32>
    %29 = arith.addf %20, %28 : vector<8x1xf32>
    %30 = math.log %29 : vector<8x1xf32>
    %31 = arith.addf %30, %15 : vector<8x1xf32>
    %cst_10 = arith.constant 1.600000e+00 : f32
    %32 = vector.broadcast %cst_10 : f32 to vector<8x1xf32>
    %33 = arith.subf %24, %32 : vector<8x1xf32>
    %34 = arith.subf %31, %33 : vector<8x1xf32>
    %cst_11 = arith.constant 0.000000e+00 : f32
    %35 = vector.broadcast %cst_11 : f32 to vector<8x1xf32>
    %36 = arith.select %9, %34, %35 : vector<8x1xi1>, vector<8x1xf32>
    %37 = vector.shape_cast %36 : vector<8x1xf32> to vector<1x8x1xf32>
    %cst_12 = arith.constant dense<0.000000e+00> : vector<1xf32>
    %38 = vector.multi_reduction <add>, %37, %cst_12 [1, 2] : vector<1x8x1xf32> to vector<1xf32>
    %39 = vector.shape_cast %38 : vector<1xf32> to vector<1x1x1xf32>
    %40 = vector.extract %39[0, 0, 0] : f32 from vector<1x1x1xf32>
    %c0_13 = arith.constant 0 : index
    %c0_14 = arith.constant 0 : index
    %41 = vector.load %arg3[%c0_13, %c0_14] : memref<8x32xf32, #tpu.memory_space<vmem>>, vector<8x32xf32>
    %cst_15 = arith.constant 1.000000e+00 : f32
    %42 = vector.broadcast %cst_15 : f32 to vector<32x128xf32>
    %43 = math.absf %41 : vector<8x32xf32>
    %cst_16 = arith.constant dense<0.000000e+00> : vector<8x128xf32>
    %44 = tpu.matmul %43, %42, %cst_16 {dimension_numbers = #tpu.dot_dimension_numbers<[1], [0], [0], [1], [0, 0, 1, 1], [], []>} : vector<8x32xf32>, vector<32x128xf32>, vector<8x128xf32> -> vector<8x128xf32>
    %45 = vector.extract_strided_slice %44 {offsets = [0, 0], sizes = [8, 1], strides = [1, 1]} : vector<8x128xf32> to vector<8x1xf32>
    %46 = arith.mulf %41, %41 : vector<8x32xf32>
    %cst_17 = arith.constant dense<0.000000e+00> : vector<8x128xf32>
    %47 = tpu.matmul %46, %42, %cst_17 {dimension_numbers = #tpu.dot_dimension_numbers<[1], [0], [0], [1], [0, 0, 1, 1], [], []>} : vector<8x32xf32>, vector<32x128xf32>, vector<8x128xf32> -> vector<8x128xf32>
    %48 = vector.extract_strided_slice %47 {offsets = [0, 0], sizes = [8, 1], strides = [1, 1]} : vector<8x128xf32> to vector<8x1xf32>
    %cst_18 = arith.constant 0.000000e+00 : f32
    %49 = vector.broadcast %cst_18 : f32 to vector<8x32xf32>
    %50 = arith.cmpf one, %41, %49 : vector<8x32xf32>
    %51 = arith.extui %50 : vector<8x32xi1> to vector<8x32xi32>
    %52 = arith.sitofp %51 : vector<8x32xi32> to vector<8x32xf32>
    %cst_19 = arith.constant dense<0.000000e+00> : vector<8x128xf32>
    %53 = tpu.matmul %52, %42, %cst_19 {dimension_numbers = #tpu.dot_dimension_numbers<[1], [0], [0], [1], [0, 0, 1, 1], [], []>} : vector<8x32xf32>, vector<32x128xf32>, vector<8x128xf32> -> vector<8x128xf32>
    %54 = vector.extract_strided_slice %53 {offsets = [0, 0], sizes = [8, 1], strides = [1, 1]} : vector<8x128xf32> to vector<8x1xf32>
    %cst_20 = arith.constant 1.000000e-16 : f32
    %55 = vector.broadcast %cst_20 : f32 to vector<8x1xf32>
    %56 = arith.maximumf %48, %55 : vector<8x1xf32>
    %57 = math.rsqrt %56 : vector<8x1xf32>
    %58 = arith.mulf %45, %57 : vector<8x1xf32>
    %cst_21 = arith.constant 1.000000e-16 : f32
    %59 = vector.broadcast %cst_21 : f32 to vector<8x1xf32>
    %60 = arith.maximumf %54, %59 : vector<8x1xf32>
    %61 = math.rsqrt %60 : vector<8x1xf32>
    %62 = arith.mulf %58, %61 : vector<8x1xf32>
    %cst_22 = arith.constant 1.000000e+00 : f32
    %63 = vector.broadcast %cst_22 : f32 to vector<8x1xf32>
    %64 = arith.subf %63, %62 : vector<8x1xf32>
    %cst_23 = arith.constant 0.000000e+00 : f32
    %65 = vector.broadcast %cst_23 : f32 to vector<8x1xf32>
    %66 = arith.select %9, %64, %65 : vector<8x1xi1>, vector<8x1xf32>
    %67 = vector.shape_cast %66 : vector<8x1xf32> to vector<1x8x1xf32>
    %cst_24 = arith.constant dense<0.000000e+00> : vector<1xf32>
    %68 = vector.multi_reduction <add>, %67, %cst_24 [1, 2] : vector<1x8x1xf32> to vector<1xf32>
    %69 = vector.shape_cast %68 : vector<1xf32> to vector<1x1x1xf32>
    %70 = vector.extract %69[0, 0, 0] : f32 from vector<1x1x1xf32>
    %71 = tpu.iota {dimensions = array<i32: 2>} : vector<1x8x128xi32>
    %c0_i32 = arith.constant 0 : i32
    %72 = vector.broadcast %c0_i32 : i32 to vector<1x8x128xi32>
    %73 = arith.cmpi eq, %71, %72 : vector<1x8x128xi32>
    %c1_i32 = arith.constant 1 : i32
    %74 = vector.broadcast %c1_i32 : i32 to vector<1x8x128xi32>
    %75 = arith.cmpi eq, %71, %74 : vector<1x8x128xi32>
    %cst_25 = arith.constant 0.000000e+00 : f32
    %76 = vector.broadcast %70 : f32 to vector<1x8x128xf32>
    %77 = vector.broadcast %cst_25 : f32 to vector<1x8x128xf32>
    %78 = arith.select %75, %76, %77 : vector<1x8x128xi1>, vector<1x8x128xf32>
    %79 = vector.broadcast %40 : f32 to vector<1x8x128xf32>
    %80 = arith.select %73, %79, %78 : vector<1x8x128xi1>, vector<1x8x128xf32>
    %c0_26 = arith.constant 0 : index
    %c0_27 = arith.constant 0 : index
    %c0_28 = arith.constant 0 : index
    %81 = vector.load %arg4[%c0_26, %c0_27, %c0_28] : memref<1x8x128xf32, #tpu.memory_space<vmem>>, vector<1x8x128xf32>
    tpu.vector_store %arg4[%c0_26, %c0_27, %c0_28], %80 {strides = array<i32>} : memref<1x8x128xf32, #tpu.memory_space<vmem>>, vector<1x8x128xf32>,
    return
  }
  func.func @transform_0(%arg0: i32) -> (i32, i32) {
    %c0_i32 = arith.constant 0 : i32
    %c0_i32_0 = arith.constant 0 : i32
    return %arg0, %c0_i32 : i32, i32
  }
  func.func @transform_1(%arg0: i32) -> (i32, i32) {
    %c0_i32 = arith.constant 0 : i32
    %c0_i32_0 = arith.constant 0 : i32
    return %arg0, %c0_i32 : i32, i32
  }
  func.func @transform_2(%arg0: i32) -> (i32, i32) {
    %c0_i32 = arith.constant 0 : i32
    %c0_i32_0 = arith.constant 0 : i32
    return %arg0, %c0_i32 : i32, i32
  }
  func.func @transform_3(%arg0: i32) -> (i32, i32, i32) {
    %c0_i32 = arith.constant 0 : i32
    %c0_i32_0 = arith.constant 0 : i32
    %c0_i32_1 = arith.constant 0 : i32
    return %arg0, %c0_i32, %c0_i32_0 : i32, i32, i32
  }
}

</mosaic_0001>

<bundles_post_ra>
// kernel: tpu_custom_call.1
= control target key start
LH: loop header
LB: loop body
LE: loop exit
PB: predicated region body
PF: predicated region fallthrough
CT: control target
= control target key end

     0   :  { %8 = vsyncpa [#allocation3], 0  ;;  %s382_s0 = inlined_call_operand.vmem [shape: f32[8,32], index: 0, kind: input, shape index: {}]   ;;  %s383_s1 = inlined_call_operand.vmem [shape: s32[8,1], index: 1, kind: input, shape index: {}]   ;;  %s384_s2 = inlined_call_operand.hbm [shape: f32[8,32], index: 2, kind: input, shape index: {}]   ;;  %s385_s3 = inlined_call_operand.hbm [shape: f32[1,8,128], index: 3, kind: output, shape index: {}]  }
   0x1   :  { %9 = vsyncpa [#allocation4], 0  ;;  %s19_s14 = sshll.u32 %s384_s2, 4  ;;  %s334_s15 = smov [#allocation2]   ;;  %s20_s14 = int_to_ptr.hbm [resolvable:$true] %s19_s14 }
   0x2   :  { %s21_s16 = sshll.u32 %s334_s15, 4  ;;  %s22_s16 = int_to_ptr.vmem [resolvable:$true] %s21_s16 }
   0x3   :  { %24 = dma.hbm_to_vmem [thread:$0]  %s20_s14, 128, %s22_s16, [#allocation3]  }
   0x4   :  { %330 = dma.done.wait [#allocation3], 128  }
   0x5   :  { %331 = vsyncadd [#allocation3], 4294967168  ;;  %v335_v0 = vmov 0   ;;  %v29_v1 = vld [vmem:[%s382_s0] sm:$0xff]  ;;  %vm44_vm0 = vcmask 261120   ;;  %v336_v5 = vmov 1.0   ;;  %v38_v13 = vlaneseq }
   0x6   :  { %271 = vset.pattern.permute.xlu0 %v335_v0  ;;  %v30_v2 = vmul.f32 8.0, %v29_v1  ;;  %v31_v4 = vld [vmem:[%s383_s1] sm:$0xff]  ;;  %161 = vmatpush.msra.mxu3 %v336_v5  ;;  %v337_v15 = vmov 0.0   ;;  %vm109_vm9 = vcmask 7168   ;;  %s338_s0 = smov [#allocation5]   ;;  %s245_s23 = sshll.u32 %s385_s3, 4  ;;  %s246_s23 = int_to_ptr.hbm [resolvable:$true] %s245_s23 }
   0x7   :  { %66 = vmatpush.msra.mxu0 %v336_v5  ;;  %v120_v6 = vld [vmem:[#allocation2] sm:$0xff]  ;;  %90 = vmatpush.msra.mxu1 %v336_v5  ;;  %v372_v14 = vand.u32 127, %v38_v13  ;;  %s243_s1 = sshll.u32 %s338_s0, 4  ;;  %s244_s1 = int_to_ptr.vmem [resolvable:$true] %s243_s1 }
   0x8   :  { %v45_v3 = vsel %vm44_vm0, %v30_v2, -inf  ;;  %137 = vmatpush.msra.mxu2 %v336_v5  ;;  %162 = vmatpush.msra.mxu3 %v336_v5  ;;  %v145_v7 = vmul.f32 %v120_v6, %v120_v6  ;;  %v121_v8 = vand.u32 2147483647, %v120_v6  ;;  %vm169_vm1 = vcmp.ne.f32.partialorder %v120_v6, 0.0 }
   0x9   :  { %46 = vmax.xlane.f32.xlu0 %v45_v3  ;;  %67 = vmatpush.msra.mxu0 %v336_v5  ;;  %v260_v16 = vsel %vm169_vm1, 1.0, %v337_v15  ;;  %vm232_vm10 = vcmp.eq.s32.totalorder %v372_v14, 1  ;;  %vm231_vm11 = vcmp.eq.s32.totalorder %v372_v14, 0 }
   0xa   :  { %91 = vmatpush.msra.mxu1 %v336_v5  ;;  %138 = vmatpush.msra.mxu2 %v336_v5 }
   0xb   :  { %163 = vmatpush.msra.mxu3 %v336_v5  ;;  %68 = vmatpush.msra.mxu0 %v336_v5 }
   0xc   :  { %92 = vmatpush.msra.mxu1 %v336_v5  ;;  %139 = vmatpush.msra.mxu2 %v336_v5 }
   0xd   :  { %164 = vmatpush.msra.mxu3 %v336_v5  ;;  %69 = vmatpush.msra.mxu0 %v336_v5 }
   0xe   :  { %259 = vmatmul.msk.f32.vlgmr.msra.gmra.mxu3 %vm44_vm0, %v145_v7  ;;  %93 = vmatpush.msra.mxu1 %v336_v5 }
   0xf   :  { %187 = vmatpush.msrb.mxu0 %v336_v5  ;;  %140 = vmatpush.msra.mxu2 %v336_v5 }
  0x10   :  { %258 = vmatmul.msk.f32.vlgmr.msra.gmra.mxu2 %vm44_vm0, %v121_v8 }
  0x11   :  { %188 = vmatpush.msrb.mxu0 %v336_v5 }
  0x13   :  { %189 = vmatpush.msrb.mxu0 %v336_v5 }
  0x15   :  { %190 = vmatpush.msrb.mxu0 %v336_v5 }
  0x1d   :  { %41 = vperm.xlu0 %271, %v31_v4  }
  0x7c   :  { %v47_v9 = vpop.xlane.xlu0 %46 }
  0x7d   :  { %v48_v10 = vsub.f32 %v30_v2, %v47_v9 }
  0x7f   :  { %v49_v11 = vmul.f32 1.442695, %v48_v10 }
  0x81   :  { %272 = vpow2.f32 %v49_v11 }
  0x87   :  { %v273_v12 = vpop.eup %272 }
  0x88   :  { %255 = vmatmul.msk.f32.vlgmr.msra.gmra.mxu0 %vm44_vm0, %v273_v12 }
  0x8f   :  { %v42_v17 = vpop.permute.xlu0 %41 }
  0x90   :  { %vm43_vm2 = vcmp.eq.s32.totalorder %v372_v14, %v42_v17  ;;  %261 = vmatmul.msk.f32.vlgmr.msrb.gmra.mxu0 %vm44_vm0, %v260_v16 }
  0x91   :  { %v74_v18 = vsel %vm43_vm2, %v30_v2, 0.0  ;;  %v166_v19 = vpop.f32.mrf.mxu3 }
  0x92   :  { %256 = vmatmul.msk.f32.vlgmr.msra.gmra.mxu1 %vm44_vm0, %v74_v18  ;;  %v195_v20 = vmax.f32 %v166_v19, 1e-16 }
  0x93   :  { %v142_v42 = vpop.f32.mrf.mxu2 }
  0x94   :  { %274 = vrsqrt.f32 %v195_v20  ;;  %vm202_vm3 = vweird.f32 %v195_v20 }
  0x9a   :  { %v275_v23 = vpop.eup %274 }
  0x9b   :  { %v197_v27 = vmul.f32 %v275_v23, %v195_v20  ;;  %vm203_vm4 = vweird.f32 %v275_v23 }
  0x9c   :  { %vm204_vm5 = vmor %vm202_vm3, %vm203_vm4 }
  0x9d   :  { %v198_v29 = vmul.f32 %v275_v23, %v197_v27 }
  0x9f   :  { %v199_v32 = vmul.f32 0.5, %v198_v29 }
  0xa1   :  { %v200_v36 = vsub.f32 1.5, %v199_v32 }
  0xa3   :  { %v201_v40 = vmul.f32 %v275_v23, %v200_v36 }
  0xa5   :  { %v205_v43 = vsel %vm204_vm5, %v275_v23, %v201_v40 }
  0xa6   :  { %v206_v47 = vmul.f32 %v205_v43, %v142_v42 }
 0x105   :  { %v71_v21 = vpop.f32.mrf.mxu0 }
 0x10d   :  { %v192_v22 = vpop.f32.mrf.mxu0 }
 0x10e   :  { %v207_v24 = vmax.f32 %v192_v22, 1e-16 }
 0x10f   :  { %v95_v25 = vpop.f32.mrf.mxu1 }
 0x110   :  { %276 = vrsqrt.f32 %v207_v24  ;;  %v98_v26 = vsub.f32 %v95_v25, %v47_v9  ;;  %vm214_vm6 = vweird.f32 %v207_v24  ;;  %v257_v46 = vadd.f32 -1.6, %v95_v25 }
 0x112   :  { %v99_v28 = vmul.f32 1.442695, %v98_v26 }
 0x114   :  { %278 = vpow2.f32 %v99_v28 }
 0x116   :  { %v277_v30 = vpop.eup %276 }
 0x117   :  { %v209_v31 = vmul.f32 %v277_v30, %v207_v24  ;;  %vm215_vm7 = vweird.f32 %v277_v30 }
 0x118   :  { %vm216_vm8 = vmor %vm214_vm6, %vm215_vm7 }
 0x119   :  { %v210_v33 = vmul.f32 %v277_v30, %v209_v31 }
 0x11a   :  { %v279_v34 = vpop.eup %278 }
 0x11b   :  { %v101_v35 = vmul.f32 -0.7981035, %v279_v34  ;;  %v211_v37 = vmul.f32 0.5, %v210_v33 }
 0x11d   :  { %v102_v38 = vadd.f32 %v101_v35, %v71_v21  ;;  %v212_v39 = vsub.f32 1.5, %v211_v37 }
 0x11f   :  { %280 = vlog2.f32 %v102_v38  ;;  %v213_v44 = vmul.f32 %v277_v30, %v212_v39 }
 0x121   :  { %v217_v49 = vsel %vm216_vm8, %v277_v30, %v213_v44 }
 0x122   :  { %v218_v51 = vmul.f32 %v217_v49, %v206_v47 }
 0x124   :  { %v219_v53 = vsub.f32 1.0, %v218_v51 }
 0x125   :  { %v281_v41 = vpop.eup %280 }
 0x126   :  { %v104_v45 = vmul.f32 0.6931472, %v281_v41  ;;  %v221_v54 = vsel %vm109_vm9, %v219_v53, 0.0 }
 0x128   :  { %v105_v48 = vadd.f32 %v104_v45, %v47_v9 }
 0x12a   :  { %v107_v50 = vsub.f32 %v105_v48, %v257_v46 }
 0x12c   :  { %v110_v52 = vsel %vm109_vm9, %v107_v50, 0.0 }
 0x12d   :  { %111 = vadd.xlane.f32.xlu1 %v110_v52 }
 0x135   :  { %222 = vadd.xlane.f32.xlu1 %v221_v54 }
 0x1a0   :  { %v112_v55 = vpop.xlane.xlu1 %111 }
 0x1a1   :  { %v113_v56 = vrot.slane %v112_v55, 4 }
 0x1a3   :  { %v114_v57 = vadd.f32 %v113_v56, %v112_v55 }
 0x1a5   :  { %v115_v58 = vrot.slane %v114_v57, 2 }
 0x1a7   :  { %v116_v59 = vadd.f32 %v115_v58, %v114_v57 }
 0x1a8   :  { %v223_v60 = vpop.xlane.xlu1 %222 }
 0x1a9   :  { %v224_v61 = vrot.slane %v223_v60, 4  ;;  %v117_v62 = vrot.slane %v116_v59, 1 }
 0x1ab   :  { %v225_v63 = vadd.f32 %v224_v61, %v223_v60  ;;  %v118_v0 = vadd.f32 %v117_v62, %v116_v59 }
 0x1ad   :  { %v226_v1 = vrot.slane %v225_v63, 2  ;;  %262 = vpush %v118_v0 }
 0x1af   :  { %v227_v2 = vadd.f32 %v226_v1, %v225_v63 }
 0x1b1   :  { %v228_v3 = vrot.slane %v227_v2, 1 }
 0x1b3   :  { %v229_v4 = vadd.f32 %v228_v3, %v227_v2 }
 0x1b5   :  { %264 = vpush %v229_v4 }
 0x1de   :  { %s263_s20 = spop %262 }
 0x1df   :  { %v235_v6 = vstv %s263_s20 }
 0x1e6   :  { %s265_s24 = spop %264 }
 0x1e7   :  { %v233_v5 = vstv %s265_s24 }
 0x1e8   :  { %v234_v7 = vsel %vm232_vm10, %v233_v5, 0.0 }
 0x1e9   :  { %v236_v8 = vsel %vm231_vm11, %v235_v6, %v234_v7 }
 0x1ea   :  { %237 = vst [vmem:[#allocation5] sm:$0xff] %v236_v8 }
 0x1eb   :  { %248 = dma.vmem_to_hbm [thread:$0]  %s244_s1, 128, %s246_s23, [#allocation4]  }
 0x1ec   :  { %332 = dma.done.wait [#allocation4], 128  }
 0x1ed   :  { %333 = vsyncadd [#allocation4], 4294967168 }
 0x1ee   :  { %253 = vsyncpa [#allocation3], 1 }
 0x1ef   :  { %254 = vsyncpa [#allocation4], 1 }

</bundles_post_ra>
